<compile_context>
chip_gen: v7x
topology: tpu7x:2x2x1
jax: 0.10.0
libtpu: 0.0.40
codegen_flags: <defaults>
</compile_context>

<pallas_src>
import functools

import jax
import jax.numpy as jnp
from jax.experimental import pallas as pl
from jax.experimental.pallas import tpu as pltpu


def _round_up(v, m):
    return ((v + m - 1) // m) * m


def _cdiv(a, b):
    return -(-a // b)


def _pick_tile_128(dim, want):
    """Largest multiple of 128 that divides `dim` (a 128-multiple) and is <= want."""
    t = max(128, (min(want, dim) // 128) * 128)
    while dim % t:
        t -= 128
    return t


# ---------------------------------------------------------------------------
# Kernels
# ---------------------------------------------------------------------------

def _fused_kernel(x_ref, w_ref, b_ref, o_ref, *, compute_dtype):
    # Whole K in one block: single MXU dot + bias epilogue.  No scratch,
    # no pl.when, fully "parallel" grid.
    acc = jnp.dot(x_ref[...].astype(compute_dtype), w_ref[...],
                  preferred_element_type=jnp.float32)
    o_ref[...] = (acc + b_ref[...]).astype(o_ref.dtype)


def _ksplit_f32out_kernel(x_ref, w_ref, b_ref, o_ref, *, compute_dtype):
    # f32 output: accumulate directly into the VMEM-resident output block.
    # Bias is the k==0 initializer, so there is no finalize step at all.
    @pl.when(pl.program_id(2) == 0)
    def _():
        o_ref[...] = jnp.broadcast_to(b_ref[...], o_ref.shape)

    o_ref[...] += jnp.dot(x_ref[...].astype(compute_dtype), w_ref[...],
                          preferred_element_type=jnp.float32)


def _ksplit_kernel(x_ref, w_ref, b_ref, o_ref, acc_ref, *, compute_dtype):
    # Narrow (e.g. bf16) output: f32 VMEM accumulator, cast once at the end.
    k = pl.program_id(2)

    @pl.when(k == 0)
    def _():
        acc_ref[...] = jnp.broadcast_to(b_ref[...], acc_ref.shape)

    acc_ref[...] += jnp.dot(x_ref[...].astype(compute_dtype), w_ref[...],
                            preferred_element_type=jnp.float32)

    @pl.when(k == pl.num_programs(2) - 1)
    def _():
        o_ref[...] = acc_ref[...].astype(o_ref.dtype)


# ---------------------------------------------------------------------------
# Wrapper
# ---------------------------------------------------------------------------

@functools.partial(jax.jit,
                   static_argnames=("compute_dtype", "tm", "tn", "tk", "fuse_k"))
def sequence_wise_linear(x, weight, bias, *, compute_dtype=None,
                         tm=1024, tn=512, tk=512, fuse_k=None):
    """y = (x collapsed to (B*T, H)) @ weight + bias, reshaped to (B, T, O).

    x:      (B, T, H)
    weight: (H, O)
    bias:   (O,)
    compute_dtype: MXU input dtype (default: x.dtype).  On v6e/v7x prefer
        jnp.bfloat16 when accuracy allows — accumulation stays in f32.
    """
    B, T, H = x.shape
    O = weight.shape[1]
    M = B * T
    out_dtype = x.dtype
    if compute_dtype is None:
        compute_dtype = x.dtype
    compute_dtype = jnp.dtype(compute_dtype)

    x_itemsize = jnp.dtype(x.dtype).itemsize
    w_itemsize = compute_dtype.itemsize
    o_itemsize = jnp.dtype(out_dtype).itemsize

    # Sublane granularity for the M axis (x / output blocks keep x's dtype).
    sub = 8 if x_itemsize >= 4 else 16

    # Lane-dense 128-multiples on H / O; tiles are divisors so no extra padding
    # beyond 128-alignment is ever introduced on those axes.
    Hp = _round_up(H, 128)
    Op = _round_up(O, 128)
    tn = _pick_tile_128(Op, tn)

    # M tiling: clamp tm, then guarantee >=2 parallel blocks (v7x has 2 TCs
    # sharded over the parallel axes) by shrinking tm rather than growing it.
    Mp_min = _round_up(M, sub)
    tm = _round_up(min(tm, Mp_min), sub)
    n_n = Op // tn
    if n_n * _cdiv(Mp_min, tm) < 2 and Mp_min > sub:
        tm = _round_up(_cdiv(Mp_min, 2), sub)
    Mp = _round_up(M, tm)
    n_m = Mp // tm

    # Fuse the whole reduction when the working set fits comfortably in VMEM
    # (safe budget for v7x's 64 MiB; trivially fine on v5e/v6e's 128 MiB).
    fused_vmem = 2 * (tm * Hp * x_itemsize + Hp * tn * w_itemsize
                      + tm * tn * o_itemsize)
    if fuse_k is None:
        fuse_k = fused_vmem <= 40 * 1024 * 1024

    # --- Wrapper glue: collapse (B,T,H)->(M,H); pad only when needed. -------
    x2d = x.reshape(M, H)
    if Mp != M or Hp != H:
        x2d = jnp.pad(x2d, ((0, Mp - M), (0, Hp - H)))

    w2d = weight if weight.dtype == compute_dtype else weight.astype(compute_dtype)
    if Hp != H or Op != O:
        w2d = jnp.pad(w2d, ((0, Hp - H), (0, Op - O)))

    b2d = bias.reshape(1, O).astype(jnp.float32)
    if Op != O:
        b2d = jnp.pad(b2d, ((0, 0), (0, Op - O)))

    # HBM traffic estimate (advisory): x re-read per N block, weight per M block.
    bytes_accessed = (Mp * Hp * x_itemsize * n_n
                      + Hp * Op * w_itemsize * n_m
                      + Op * 4 * n_m
                      + Mp * Op * o_itemsize)
    flops = 2 * Mp * Hp * Op

    if fuse_k:
        grid = (n_m, n_n)
        kernel = functools.partial(_fused_kernel, compute_dtype=compute_dtype)
        in_specs = [
            pl.BlockSpec((tm, Hp), lambda i, j: (i, 0)),   # x tile (full K)
            pl.BlockSpec((Hp, tn), lambda i, j: (0, j)),   # weight tile
            pl.BlockSpec((1, tn), lambda i, j: (0, j)),    # bias tile (f32)
        ]
        out_specs = pl.BlockSpec((tm, tn), lambda i, j: (i, j))
        scratch_shapes = []
        dim_sem = ("parallel", "parallel")
        vmem_est = fused_vmem
    else:
        tk = _pick_tile_128(Hp, tk)
        grid = (n_m, n_n, Hp // tk)
        f32_out = jnp.dtype(out_dtype) == jnp.dtype(jnp.float32)
        if f32_out:
            kernel = functools.partial(_ksplit_f32out_kernel,
                                       compute_dtype=compute_dtype)
            scratch_shapes = []
            acc_bytes = 0
        else:
            kernel = functools.partial(_ksplit_kernel,
                                       compute_dtype=compute_dtype)
            scratch_shapes = [pltpu.VMEM((tm, tn), jnp.float32)]
            acc_bytes = tm * tn * 4
        in_specs = [
            pl.BlockSpec((tm, tk), lambda i, j, k: (i, k)),   # x tile
            pl.BlockSpec((tk, tn), lambda i, j, k: (k, j)),   # weight tile
            pl.BlockSpec((1, tn), lambda i, j, k: (0, j)),    # bias tile (f32)
        ]
        out_specs = pl.BlockSpec((tm, tn), lambda i, j, k: (i, j))
        dim_sem = ("parallel", "parallel", "arbitrary")
        vmem_est = (2 * (tm * tk * x_itemsize + tk * tn * w_itemsize
                         + tm * tn * o_itemsize) + acc_bytes)

    vmem_limit = int(min(max(vmem_est + (8 << 20), 32 << 20), 48 << 20))

    out2d = pl.pallas_call(
        kernel,
        out_shape=jax.ShapeDtypeStruct((Mp, Op), out_dtype),
        grid_spec=pltpu.PrefetchScalarGridSpec(
            num_scalar_prefetch=0,
            grid=grid,
            in_specs=in_specs,
            out_specs=out_specs,
            scratch_shapes=scratch_shapes,
        ),
        compiler_params=pltpu.CompilerParams(
            dimension_semantics=dim_sem,
            vmem_limit_bytes=vmem_limit,
        ),
        cost_estimate=pl.CostEstimate(
            flops=flops,
            transcendentals=0,
            bytes_accessed=bytes_accessed,
        ),
    )(x2d, w2d, b2d)

    # Wrapper glue: drop padding (if any) and restore (B, T, O).
    if Mp != M or Op != O:
        out2d = out2d[:M, :O]
    return out2d.reshape(B, T, O)


# ---------------------------------------------------------------------------
# Self-test
# ---------------------------------------------------------------------------

if __name__ == "__main__":
    key = jax.random.PRNGKey(0)
    k_x, k_w, k_b, k_x2, k_w2, k_b2 = jax.random.split(key, 6)

    # --- test 1: canonical SequenceWise(Linear) shapes, fused-K f32 path.
    B, T, H, O = 2, 8, 32, 64
    x = jax.random.normal(k_x, (B, T, H), dtype=jnp.float32)
    bound = 1.0 / (H ** 0.5)
    w = jax.random.uniform(k_w, (H, O), minval=-bound, maxval=bound,
                           dtype=jnp.float32)
    b = jax.random.uniform(k_b, (O,), minval=-bound, maxval=bound,
                           dtype=jnp.float32)
    ref = (x.reshape(B * T, H) @ w + b).reshape(B, T, O)

    y = jax.block_until_ready(sequence_wise_linear(x, w, b))
    assert y.shape == (B, T, O)
    assert jnp.allclose(y, ref, atol=1e-5, rtol=1e-5)

    # --- test 2: forced K-split, f32 output (accumulate directly in o_ref).
    H2, O2 = 256, 256
    x2 = jax.random.normal(k_x2, (B, T, H2), dtype=jnp.float32)
    bound2 = 1.0 / (H2 ** 0.5)
    w2 = jax.random.uniform(k_w2, (H2, O2), minval=-bound2, maxval=bound2,
                            dtype=jnp.float32)
    b2 = jax.random.uniform(k_b2, (O2,), minval=-bound2, maxval=bound2,
                            dtype=jnp.float32)
    ref2 = (x2.reshape(B * T, H2) @ w2 + b2).reshape(B, T, O2)

    y2 = jax.block_until_ready(
        sequence_wise_linear(x2, w2, b2, tn=128, tk=128, fuse_k=False))
    assert jnp.allclose(y2, ref2, atol=1e-5, rtol=1e-5)

    # --- test 3: bf16 input/output, forced K-split (f32 scratch accumulator).
    x3 = x2.astype(jnp.bfloat16)
    ref3 = (x3.astype(jnp.float32).reshape(B * T, H2)
            @ w2.astype(jnp.bfloat16).astype(jnp.float32) + b2).reshape(B, T, O2)
    y3 = jax.block_until_ready(
        sequence_wise_linear(x3, w2, b2, tn=128, tk=128, fuse_k=False))
    assert y3.dtype == jnp.bfloat16
    assert jnp.allclose(y3.astype(jnp.float32), ref3, atol=2e-2, rtol=2e-2)

    # --- test 4: bf16 MXU compute on f32 inputs (v6e/v7x fast path), fused.
    refb = (x2.astype(jnp.bfloat16).astype(jnp.float32).reshape(B * T, H2)
            @ w2.astype(jnp.bfloat16).astype(jnp.float32) + b2).reshape(B, T, O2)
    y4 = jax.block_until_ready(
        sequence_wise_linear(x2, w2, b2, compute_dtype=jnp.bfloat16))
    assert jnp.allclose(y4, refb, atol=1e-2, rtol=1e-2)

    print("KERNEL_OK")
</pallas_src>

<mosaic_0001>
module attributes {stable_mosaic.version = 11 : i64} {
  func.func @_fused_kernel(%arg0: i32, %arg1: i32, %arg2: memref<8x128xf32, #tpu.memory_space<vmem>>, %arg3: memref<128x128xf32, #tpu.memory_space<vmem>>, %arg4: memref<1x128xf32, #tpu.memory_space<vmem>>, %arg5: memref<8x128xf32, #tpu.memory_space<vmem>>) attributes {dimension_semantics = [#tpu.dimension_semantics<parallel>, #tpu.dimension_semantics<parallel>], iteration_bounds = array<i64: 2, 1>, scalar_prefetch = 0 : i64, scratch_operands = 0 : i64, tpu.core_type = #tpu.core_type<tc>, window_params = [{transform_indices = @transform_0, window_bounds = array<i64: 8, 128>}, {transform_indices = @transform_1, window_bounds = array<i64: 128, 128>}, {transform_indices = @transform_2, window_bounds = array<i64: 1, 128>}, {transform_indices = @transform_3, window_bounds = array<i64: 8, 128>}]} {
    %c0 = arith.constant 0 : index
    %c0_0 = arith.constant 0 : index
    %0 = vector.load %arg2[%c0, %c0_0] : memref<8x128xf32, #tpu.memory_space<vmem>>, vector<8x128xf32>
    %c0_1 = arith.constant 0 : index
    %c0_2 = arith.constant 0 : index
    %1 = vector.load %arg3[%c0_1, %c0_2] : memref<128x128xf32, #tpu.memory_space<vmem>>, vector<128x128xf32>
    %cst = arith.constant dense<0.000000e+00> : vector<8x128xf32>
    %2 = tpu.matmul %0, %1, %cst {dimension_numbers = #tpu.dot_dimension_numbers<[1], [0], [0], [1], [0, 0, 1, 1], [], []>} : vector<8x128xf32>, vector<128x128xf32>, vector<8x128xf32> -> vector<8x128xf32>
    %c0_3 = arith.constant 0 : index
    %c0_4 = arith.constant 0 : index
    %3 = vector.load %arg4[%c0_3, %c0_4] : memref<1x128xf32, #tpu.memory_space<vmem>>, vector<1x128xf32>
    %4 = vector.broadcast %3 : vector<1x128xf32> to vector<8x128xf32>
    %5 = arith.addf %2, %4 : vector<8x128xf32>
    %c0_5 = arith.constant 0 : index
    %c0_6 = arith.constant 0 : index
    %6 = vector.load %arg5[%c0_5, %c0_6] : memref<8x128xf32, #tpu.memory_space<vmem>>, vector<8x128xf32>
    tpu.vector_store %arg5[%c0_5, %c0_6], %5 {strides = array<i32>} : memref<8x128xf32, #tpu.memory_space<vmem>>, vector<8x128xf32>,
    return
  }
  func.func @transform_0(%arg0: i32, %arg1: i32) -> (i32, i32) {
    %c0_i32 = arith.constant 0 : i32
    %c0_i32_0 = arith.constant 0 : i32
    return %arg0, %c0_i32 : i32, i32
  }
  func.func @transform_1(%arg0: i32, %arg1: i32) -> (i32, i32) {
    %c0_i32 = arith.constant 0 : i32
    %c0_i32_0 = arith.constant 0 : i32
    return %c0_i32, %arg1 : i32, i32
  }
  func.func @transform_2(%arg0: i32, %arg1: i32) -> (i32, i32) {
    %c0_i32 = arith.constant 0 : i32
    %c0_i32_0 = arith.constant 0 : i32
    return %c0_i32, %arg1 : i32, i32
  }
  func.func @transform_3(%arg0: i32, %arg1: i32) -> (i32, i32) {
    %c0_i32 = arith.constant 0 : i32
    return %arg0, %arg1 : i32, i32
  }
}

</mosaic_0001>

<bundles_post_ra>
// kernel: sequence_wise_linear.1
= control target key start
LH: loop header
LB: loop body
LE: loop exit
PB: predicated region body
PF: predicated region fallthrough
CT: control target
= control target key end

     0   :  { %s573_s12 = smov 0   ;;  %s575_s13 = smov 0   ;;  %s661_s0 = inlined_call_operand.vmem [shape: f32[16,128], index: 0, kind: input, shape index: {}]   ;;  %s662_s1 = inlined_call_operand.vmem [shape: f32[128,128], index: 1, kind: input, shape index: {}]   ;;  %s663_s2 = inlined_call_operand.vmem [shape: f32[1,128], index: 2, kind: input, shape index: {}]   ;;  %s664_s3 = inlined_call_operand.vmem [shape: f32[16,128], index: 3, kind: output, shape index: {}]  }
   0x1   :  { %s577_s14 = smov 0  }
   0x2 LB: > { %s25_s15 = sadd.s32 1, %s544_s13  ;;  %p417_p0 = scmp.ge.s32.totalorder %s548_s14, 1  ;;  %s548_s14 = sphi %s577_s14, %s13_s14   ;;  %s544_s13 = sphi %s575_s13, %s666_s13   ;;  %s540_s12 = sphi %s573_s12, %s665_s12  }
   0x3   : > { %p27_p1 = scmp.ge.s32.totalorder %s25_s15, 2  ;;  %p167_p2 = scmp.lt.s32.totalorder %s548_s14, 3 }
   0x5   : > { %s668_s15 = smov (%p27_p1, %s25_s15), 0  ;;  %p168_p3 = pnand %p417_p0, %p167_p2 }
   0x6   : > { %v218_v0 = vld [vmem:[%s662_s1] sm:$0xff] (!%p168_p3)  ;;  %v219_v1 = vld [vmem:[%s662_s1 + $0x8] sm:$0xff] (!%p168_p3)  ;;  %v220_v2 = vld [vmem:[%s662_s1 + $0x10] sm:$0xff] (!%p168_p3)  ;;  %v550_v3 = vmov (!%p168_p3), 0.0|0.0   ;;  %vm551_vm0 = vmmov (!%p168_p3), 0   ;;  %v552_v6 = vmov (!%p168_p3), 0.0  }
   0x7   : > { %171 = sbr.rel (%p168_p3) target bundleno = 255 (0xff), region = 32  ;;  %475 = vmatprep.subr.bf16.mxu0 (!%p168_p3), %v550_v3  ;;  %v476_v4 = vpack.c.bf16 (!%p168_p3), %v219_v1, %v218_v0  ;;  %v221_v5 = vld [vmem:[%s662_s1 + $0x18] sm:$0xff] (!%p168_p3)  ;;  %472 = vmatprep.mubr.msk.f32.mxu0 (!%p168_p3), %vm551_vm0, %v552_v6  ;;  %v222_v8 = vld [vmem:[%s662_s1 + $0x20] sm:$0xff] (!%p168_p3)  ;;  %v223_v9 = vld [vmem:[%s662_s1 + $0x28] sm:$0xff] (!%p168_p3)  ;;  %p199_p4 = scmp.lt.s32.totalorder (!%p168_p3), %s540_s12, 1 }
   0x8   : > { %v479_v7 = vpack.c.bf16 (!%p168_p3), %v221_v5, %v220_v2  ;;  %v482_v10 = vpack.c.bf16 (!%p168_p3), %v223_v9, %v222_v8  ;;  %v224_v11 = vld [vmem:[%s662_s1 + $0x30] sm:$0xff] (!%p168_p3)  ;;  %v225_v12 = vld [vmem:[%s662_s1 + $0x38] sm:$0xff] (!%p168_p3)  ;;  %v226_v14 = vld [vmem:[%s662_s1 + $0x40] sm:$0xff] (!%p168_p3) }
   0x9   : > { %477 = vmatpush3.bf16.msra.mxu0 (!%p168_p3), %v476_v4  ;;  %v485_v13 = vpack.c.bf16 (!%p168_p3), %v225_v12, %v224_v11  ;;  %v227_v15 = vld [vmem:[%s662_s1 + $0x48] sm:$0xff] (!%p168_p3)  ;;  %v228_v17 = vld [vmem:[%s662_s1 + $0x50] sm:$0xff] (!%p168_p3)  ;;  %v229_v18 = vld [vmem:[%s662_s1 + $0x58] sm:$0xff] (!%p168_p3) }
   0xa   : > { %478 = vmatprep.subr.bf16.mxu0 (!%p168_p3), %v550_v3  ;;  %v488_v16 = vpack.c.bf16 (!%p168_p3), %v227_v15, %v226_v14  ;;  %v491_v19 = vpack.c.bf16 (!%p168_p3), %v229_v18, %v228_v17  ;;  %v230_v20 = vld [vmem:[%s662_s1 + $0x60] sm:$0xff] (!%p168_p3)  ;;  %v231_v21 = vld [vmem:[%s662_s1 + $0x68] sm:$0xff] (!%p168_p3)  ;;  %v232_v23 = vld [vmem:[%s662_s1 + $0x70] sm:$0xff] (!%p168_p3) }
   0xb   : > { %v494_v22 = vpack.c.bf16 (!%p168_p3), %v231_v21, %v230_v20  ;;  %v233_v24 = vld [vmem:[%s662_s1 + $0x78] sm:$0xff] (!%p168_p3)  ;;  %v420_v27 = vld [vmem:[%s663_s2] ss:$0 sm:$0xff] (!%p168_p3) }
   0xc   : > { %v497_v25 = vpack.c.bf16 (!%p168_p3), %v233_v24, %v232_v23 }
   0xd   : > { %480 = vmatpush3.bf16.msra.mxu0 (!%p168_p3), %v479_v7 }
   0xe   : > { %481 = vmatprep.subr.bf16.mxu0 %v550_v3  ;;  %s670_s12 = smov (!%p199_p4, %s540_s12), 1 }
   0xf   : > { %s418_s25 = sshll.u32 %s670_s12, 3 }
  0x10   : > { %s202_s28 = scalar_lea.vmem %s661_s0, %s418_s25  ;;  %s216_s6 = scalar_lea.vmem %s664_s3, %s418_s25 }
  0x11   : > { %483 = vmatpush3.bf16.msra.mxu0 %v482_v10  ;;  %v217_v26 = vld [vmem:[%s202_s28] sm:$0xff] }
  0x12   : > { %484 = vmatprep.subr.bf16.mxu0 %v550_v3 }
  0x15   : > { %486 = vmatpush3.bf16.msra.mxu0 %v485_v13 }
  0x16   : > { %487 = vmatprep.subr.bf16.mxu0 %v550_v3 }
  0x19   : > { %489 = vmatpush3.bf16.msra.mxu0 %v488_v16 }
  0x1a   : > { %490 = vmatprep.subr.bf16.mxu0 %v550_v3 }
  0x1d   : > { %492 = vmatpush3.bf16.msra.mxu0 %v491_v19 }
  0x1e   : > { %493 = vmatprep.subr.bf16.mxu0 %v550_v3 }
  0x21   : > { %495 = vmatpush3.bf16.msra.mxu0 %v494_v22 }
  0x22   : > { %496 = vmatprep.subr.bf16.mxu0 %v550_v3 }
  0x25   : > { %498 = vmatpush3.bf16.msra.mxu0 %v497_v25 }
  0x28   : > { %473 = vmatmul.mubr.f32.vlgmr.msra.gmra.mrb[0].mxu0 %v217_v26 }
  0xfb   : > { %v307_v28 = vpop.f32.mrb[0].mxu0 }
  0xfc   : > { %v308_v29 = vadd.f32 %v420_v27, %v307_v28  ;;  %v474_v30 = vpop.f32.mrb[1].mxu0 }
  0xfe   : > { %311 = vst [vmem:[%s216_s6] sm:$0xff] %v308_v29 }
  0xff PF: > { %s13_s14 = sadd.s32 1, %s548_s14   ;;  %s665_s12 = smov %s544_s13 }
 0x100   : > { %p10_p5 = scmp.ge.s32.totalorder %s13_s14, 4   ;;  %s666_s13 = smov %s668_s15 }
 0x102   :  { %12 = sbr.rel (!%p10_p5) target bundleno = 2 (0x2), region = 68 }

</bundles_post_ra>
